<compile_context>
chip_gen: v7x
topology: tpu7x:2x2x1
jax: 0.10.0
libtpu: 0.0.40
codegen_flags: <defaults>
</compile_context>

<pallas_src>
import functools

import jax
import jax.numpy as jnp
import numpy as np
from jax import lax
from jax.experimental import pallas as pl
from jax.experimental.pallas import tpu as pltpu


# ----------------------------------------------------------------------------
# Fused kernel: (conv -> bias -> ReLU -> GroupNorm) x 2, one batch element/step
# Layout inside the kernel: channels on sublanes, padded-flat spatial on lanes.
# ----------------------------------------------------------------------------
def _layer_kernel(x_ref, w1_ref, w2_ref, aff1_ref, aff2_ref, gmat_ref, mask_ref,
                  o_ref, act_ref,
                  *, offsets, n_flat, pad_e, inv_gcount, eps, mm_dtype):
    mask = mask_ref[...]          # (1, N)     1.0 at interior pixels, 0.0 at pad ring
    gmat = gmat_ref[...]          # (Cout, Cout) group-membership matrix (f32)

    def conv_relu_gn(read_tap, wmat, aff):
        bias, gamma, beta = aff[:, 0:1], aff[:, 1:2], aff[:, 2:3]      # (Cout, 1) each
        # In-kernel im2col: k*k shifted slices stacked along sublanes.
        xcol = jnp.concatenate([read_tap(o) for o in offsets], axis=0)
        y = jnp.dot(wmat, xcol.astype(mm_dtype),
                    preferred_element_type=jnp.float32)                # (Cout, N) f32
        y = jnp.maximum(y + bias, 0.0) * mask                          # bias + ReLU, zero ring
        # GroupNorm (biased variance, PyTorch semantics), vectorized:
        # lane-reduce per channel first, then mix the channel sums within each
        # group via a tiny (Cout,Cout)@(Cout,1) matvec (instead of mixing the
        # full-width activations).
        s1 = jnp.sum(y, axis=1, keepdims=True)                         # (Cout, 1)
        mu = jnp.dot(gmat, s1, preferred_element_type=jnp.float32) * inv_gcount
        d = (y - mu) * mask
        s2 = jnp.sum(d * d, axis=1, keepdims=True)                     # (Cout, 1)
        var = jnp.dot(gmat, s2, preferred_element_type=jnp.float32) * inv_gcount
        scale = lax.rsqrt(var + eps) * gamma                           # (Cout, 1)
        return d * scale + beta                                        # (Cout, N) f32

    # ---- block 1: taps read straight from the (lane-extended) input ref ----
    y1 = conv_relu_gn(lambda o: x_ref[:, pad_e + o: pad_e + o + n_flat],
                      w1_ref[...], aff1_ref[...])

    # Dropout2d == identity (eval).  Stage the zero-padded intermediate in VMEM
    # so block 2 reads its taps directly (no HBM round trip).
    act_ref[...] = jnp.zeros(act_ref.shape, act_ref.dtype)
    act_ref[:, pad_e:pad_e + n_flat] = y1 * mask

    # ---- block 2: taps read from the VMEM-resident intermediate ----
    y2 = conv_relu_gn(lambda o: act_ref[:, pad_e + o: pad_e + o + n_flat],
                      w2_ref[...], aff2_ref[...])
    o_ref[...] = y2.astype(o_ref.dtype)


# ----------------------------------------------------------------------------
# Wrapper: layout plumbing (pad/flatten input, weight reshape, interior slice)
# ----------------------------------------------------------------------------
def layer_forward(x, params, *, kernel_size, padding, stride, groups,
                  eps=1e-5, matmul_dtype=jnp.float32):
    B, Cin, H, W = x.shape
    Cout = params["w1"].shape[0]
    k, p, s = kernel_size, padding, stride
    assert s == 1 and 2 * p == k - 1, "fused kernel assumes stride=1 'same' convs"
    assert Cout % groups == 0
    cpg = Cout // groups

    Hp, Wp = H + 2 * p, W + 2 * p
    n_flat = Hp * Wp                    # padded-flat spatial size (lane axis)
    pad_e = p * (Wp + 1)                # lane extension so every tap slice is in-bounds
    E = n_flat + 2 * pad_e

    f32 = jnp.float32
    # (B, Cin, E): zero-pad spatially, flatten, extend along lanes with zeros.
    xp = jnp.pad(x.astype(f32), ((0, 0), (0, 0), (p, p), (p, p)))
    x_ext = jnp.pad(xp.reshape(B, Cin, n_flat), ((0, 0), (0, 0), (pad_e, pad_e)))

    def wmat(w):  # (Cout, C, k, k) -> (Cout, k*k*C), tap-major / channel-minor
        co, c = w.shape[0], w.shape[1]
        return w.transpose(0, 2, 3, 1).reshape(co, k * k * c).astype(matmul_dtype)

    w1m, w2m = wmat(params["w1"]), wmat(params["w2"])

    def pack_affine(b, g, be):          # -> (Cout, 3): [bias, gamma, beta]
        return jnp.stack([b, g, be], axis=1).astype(f32)

    aff1 = pack_affine(params["b1"], params["gamma1"], params["beta1"])
    aff2 = pack_affine(params["b2"], params["gamma2"], params["beta2"])

    gid = jnp.arange(Cout) // cpg
    gmat = (gid[:, None] == gid[None, :]).astype(f32)                    # (Cout, Cout)
    mask = (jnp.zeros((Hp, Wp), f32).at[p:p + H, p:p + W].set(1.0)
            .reshape(1, n_flat))

    offsets = tuple((dy - p) * Wp + (dx - p)
                    for dy in range(k) for dx in range(k))

    kernel = functools.partial(
        _layer_kernel, offsets=offsets, n_flat=n_flat, pad_e=pad_e,
        inv_gcount=1.0 / float(cpg * H * W), eps=float(eps),
        mm_dtype=matmul_dtype)

    def const_spec(shape):
        nd = len(shape)
        return pl.BlockSpec(shape, lambda b, _nd=nd: (0,) * _nd)

    out = pl.pallas_call(
        kernel,
        out_shape=jax.ShapeDtypeStruct((B, Cout, n_flat), f32),
        grid_spec=pltpu.PrefetchScalarGridSpec(
            num_scalar_prefetch=0,
            grid=(B,),
            in_specs=[
                pl.BlockSpec((pl.Squeezed(), Cin, E), lambda b: (b, 0, 0)),
                const_spec((Cout, k * k * Cin)),
                const_spec((Cout, k * k * Cout)),
                const_spec((Cout, 3)),
                const_spec((Cout, 3)),
                const_spec((Cout, Cout)),
                const_spec((1, n_flat)),
            ],
            out_specs=pl.BlockSpec((pl.Squeezed(), Cout, n_flat),
                                   lambda b: (b, 0, 0)),
            scratch_shapes=[pltpu.VMEM((Cout, E), f32)],
        ),
        compiler_params=pltpu.CompilerParams(
            dimension_semantics=("parallel",)),
    )(x_ext, w1m, w2m, aff1, aff2, gmat, mask)

    # back to NCHW: drop the padding ring
    return out.reshape(B, Cout, Hp, Wp)[:, :, p:p + H, p:p + W]


# ----------------------------------------------------------------------------
# pure-JAX reference for verification
# ----------------------------------------------------------------------------
def _ref_block(x, w, b, gamma, beta, *, padding, stride, groups, eps=1e-5):
    y = jax.lax.conv_general_dilated(
        x, w, window_strides=(stride, stride),
        padding=[(padding, padding), (padding, padding)],
        dimension_numbers=("NCHW", "OIHW", "NCHW"))
    y = y + b[None, :, None, None]
    y = jnp.maximum(y, 0.0)
    B, C, H, W = y.shape
    yg = y.reshape(B, groups, C // groups, H, W)
    mu = yg.mean(axis=(2, 3, 4), keepdims=True)
    var = ((yg - mu) ** 2).mean(axis=(2, 3, 4), keepdims=True)
    yn = ((yg - mu) / jnp.sqrt(var + eps)).reshape(B, C, H, W)
    return yn * gamma[None, :, None, None] + beta[None, :, None, None]


def _ref_forward(x, params, *, padding, stride, groups):
    h = _ref_block(x, params["w1"], params["b1"], params["gamma1"],
                   params["beta1"], padding=padding, stride=stride, groups=groups)
    h = _ref_block(h, params["w2"], params["b2"], params["gamma2"],
                   params["beta2"], padding=padding, stride=stride, groups=groups)
    return h


if __name__ == "__main__":
    B, Cin, H, W = 2, 4, 16, 16
    Cout = 8
    kernel_size, padding, stride, groups, dropout = 3, 1, 1, 2, 0.1

    key = jax.random.PRNGKey(0)
    k1, k2, k3, k4, k5, k6, k7, kx = jax.random.split(key, 8)
    params = {
        "w1": 0.1 * jax.random.normal(k1, (Cout, Cin, kernel_size, kernel_size), jnp.float32),
        "b1": 0.1 * jax.random.normal(k2, (Cout,), jnp.float32),
        "gamma1": 1.0 + 0.1 * jax.random.normal(k3, (Cout,), jnp.float32),
        "beta1": 0.1 * jax.random.normal(k4, (Cout,), jnp.float32),
        "w2": 0.1 * jax.random.normal(k5, (Cout, Cout, kernel_size, kernel_size), jnp.float32),
        "b2": 0.1 * jax.random.normal(k6, (Cout,), jnp.float32),
        "gamma2": 1.0 + 0.1 * jax.random.normal(k7, (Cout,), jnp.float32),
        "beta2": jnp.zeros((Cout,), jnp.float32),
    }
    x = jax.random.normal(kx, (B, Cin, H, W), jnp.float32)

    ref = _ref_forward(x, params, padding=padding, stride=stride, groups=groups)

    # f32 MXU path — tight check
    out = layer_forward(x, params, kernel_size=kernel_size, padding=padding,
                        stride=stride, groups=groups, matmul_dtype=jnp.float32)
    out = jax.block_until_ready(out)
    np.testing.assert_allclose(np.asarray(out), np.asarray(ref),
                               rtol=1e-4, atol=1e-4)
    assert out.shape == (B, Cout, H, W)

    # bf16 MXU-input path (v6e/v7x suggestion) — loose check, GN math stays f32
    out_bf16 = layer_forward(x, params, kernel_size=kernel_size, padding=padding,
                             stride=stride, groups=groups,
                             matmul_dtype=jnp.bfloat16)
    out_bf16 = jax.block_until_ready(out_bf16)
    np.testing.assert_allclose(np.asarray(out_bf16), np.asarray(ref),
                               rtol=5e-2, atol=5e-2)

    print("KERNEL_OK")
</pallas_src>

<mosaic_0001>
module attributes {stable_mosaic.version = 11 : i64} {
  func.func @_layer_kernel(%arg0: i32, %arg1: memref<1x4x362xf32, #tpu.memory_space<vmem>>, %arg2: memref<8x36xf32, #tpu.memory_space<vmem>>, %arg3: memref<8x72xf32, #tpu.memory_space<vmem>>, %arg4: memref<8x3xf32, #tpu.memory_space<vmem>>, %arg5: memref<8x3xf32, #tpu.memory_space<vmem>>, %arg6: memref<8x8xf32, #tpu.memory_space<vmem>>, %arg7: memref<1x324xf32, #tpu.memory_space<vmem>>, %arg8: memref<1x8x324xf32, #tpu.memory_space<vmem>>, %arg9: memref<8x362xf32, #tpu.memory_space<vmem>>) attributes {dimension_semantics = [#tpu.dimension_semantics<parallel>], iteration_bounds = array<i64: 2>, scalar_prefetch = 0 : i64, scratch_operands = 1 : i64, tpu.core_type = #tpu.core_type<tc>, window_params = [{transform_indices = @transform_0, window_bounds = array<i64: 1, 4, 362>}, {pipeline_mode = #tpu.pipeline_mode<synchronous>, transform_indices = @transform_1, window_bounds = array<i64: 8, 36>}, {pipeline_mode = #tpu.pipeline_mode<synchronous>, transform_indices = @transform_2, window_bounds = array<i64: 8, 72>}, {pipeline_mode = #tpu.pipeline_mode<synchronous>, transform_indices = @transform_3, window_bounds = array<i64: 8, 3>}, {pipeline_mode = #tpu.pipeline_mode<synchronous>, transform_indices = @transform_4, window_bounds = array<i64: 8, 3>}, {pipeline_mode = #tpu.pipeline_mode<synchronous>, transform_indices = @transform_5, window_bounds = array<i64: 8, 8>}, {pipeline_mode = #tpu.pipeline_mode<synchronous>, transform_indices = @transform_6, window_bounds = array<i64: 1, 324>}, {transform_indices = @transform_7, window_bounds = array<i64: 1, 8, 324>}]} {
    %c0 = arith.constant 0 : index
    %c0_0 = arith.constant 0 : index
    %0 = vector.load %arg7[%c0, %c0_0] : memref<1x324xf32, #tpu.memory_space<vmem>>, vector<1x324xf32>
    %c0_1 = arith.constant 0 : index
    %c0_2 = arith.constant 0 : index
    %1 = vector.load %arg6[%c0_1, %c0_2] : memref<8x8xf32, #tpu.memory_space<vmem>>, vector<8x8xf32>
    %c0_3 = arith.constant 0 : index
    %c0_4 = arith.constant 0 : index
    %2 = vector.load %arg2[%c0_3, %c0_4] : memref<8x36xf32, #tpu.memory_space<vmem>>, vector<8x36xf32>
    %c0_5 = arith.constant 0 : index
    %c0_6 = arith.constant 0 : index
    %3 = vector.load %arg4[%c0_5, %c0_6] : memref<8x3xf32, #tpu.memory_space<vmem>>, vector<8x3xf32>
    %4 = vector.extract_strided_slice %3 {offsets = [0, 0], sizes = [8, 1], strides = [1, 1]} : vector<8x3xf32> to vector<8x1xf32>
    %5 = vector.extract_strided_slice %3 {offsets = [0, 1], sizes = [8, 1], strides = [1, 1]} : vector<8x3xf32> to vector<8x1xf32>
    %6 = vector.extract_strided_slice %3 {offsets = [0, 2], sizes = [8, 1], strides = [1, 1]} : vector<8x3xf32> to vector<8x1xf32>
    %c0_7 = arith.constant 0 : index
    %c0_8 = arith.constant 0 : index
    %c0_9 = arith.constant 0 : index
    %7 = vector.load %arg1[%c0_7, %c0_8, %c0_9] : memref<1x4x362xf32, #tpu.memory_space<vmem>>, vector<1x4x324xf32>
    %8 = vector.shape_cast %7 : vector<1x4x324xf32> to vector<4x324xf32>
    %c0_10 = arith.constant 0 : index
    %c0_11 = arith.constant 0 : index
    %c1 = arith.constant 1 : index
    %9 = vector.load %arg1[%c0_10, %c0_11, %c1] : memref<1x4x362xf32, #tpu.memory_space<vmem>>, vector<1x4x324xf32>
    %10 = vector.shape_cast %9 : vector<1x4x324xf32> to vector<4x324xf32>
    %c0_12 = arith.constant 0 : index
    %c0_13 = arith.constant 0 : index
    %c2 = arith.constant 2 : index
    %11 = vector.load %arg1[%c0_12, %c0_13, %c2] : memref<1x4x362xf32, #tpu.memory_space<vmem>>, vector<1x4x324xf32>
    %12 = vector.shape_cast %11 : vector<1x4x324xf32> to vector<4x324xf32>
    %c0_14 = arith.constant 0 : index
    %c0_15 = arith.constant 0 : index
    %c18 = arith.constant 18 : index
    %13 = vector.load %arg1[%c0_14, %c0_15, %c18] : memref<1x4x362xf32, #tpu.memory_space<vmem>>, vector<1x4x324xf32>
    %14 = vector.shape_cast %13 : vector<1x4x324xf32> to vector<4x324xf32>
    %c0_16 = arith.constant 0 : index
    %c0_17 = arith.constant 0 : index
    %c19 = arith.constant 19 : index
    %15 = vector.load %arg1[%c0_16, %c0_17, %c19] : memref<1x4x362xf32, #tpu.memory_space<vmem>>, vector<1x4x324xf32>
    %16 = vector.shape_cast %15 : vector<1x4x324xf32> to vector<4x324xf32>
    %c0_18 = arith.constant 0 : index
    %c0_19 = arith.constant 0 : index
    %c20 = arith.constant 20 : index
    %17 = vector.load %arg1[%c0_18, %c0_19, %c20] : memref<1x4x362xf32, #tpu.memory_space<vmem>>, vector<1x4x324xf32>
    %18 = vector.shape_cast %17 : vector<1x4x324xf32> to vector<4x324xf32>
    %c0_20 = arith.constant 0 : index
    %c0_21 = arith.constant 0 : index
    %c36 = arith.constant 36 : index
    %19 = vector.load %arg1[%c0_20, %c0_21, %c36] : memref<1x4x362xf32, #tpu.memory_space<vmem>>, vector<1x4x324xf32>
    %20 = vector.shape_cast %19 : vector<1x4x324xf32> to vector<4x324xf32>
    %c0_22 = arith.constant 0 : index
    %c0_23 = arith.constant 0 : index
    %c37 = arith.constant 37 : index
    %21 = vector.load %arg1[%c0_22, %c0_23, %c37] : memref<1x4x362xf32, #tpu.memory_space<vmem>>, vector<1x4x324xf32>
    %22 = vector.shape_cast %21 : vector<1x4x324xf32> to vector<4x324xf32>
    %c0_24 = arith.constant 0 : index
    %c0_25 = arith.constant 0 : index
    %c38 = arith.constant 38 : index
    %23 = vector.load %arg1[%c0_24, %c0_25, %c38] : memref<1x4x362xf32, #tpu.memory_space<vmem>>, vector<1x4x324xf32>
    %24 = vector.shape_cast %23 : vector<1x4x324xf32> to vector<4x324xf32>
    %25 = tpu.concatenate %8, %10, %12, %14, %16, %18, %20, %22, %24 in 0 : vector<4x324xf32>, vector<4x324xf32>, vector<4x324xf32>, vector<4x324xf32>, vector<4x324xf32>, vector<4x324xf32>, vector<4x324xf32>, vector<4x324xf32>, vector<4x324xf32> -> vector<36x324xf32>
    %cst = arith.constant dense<0.000000e+00> : vector<8x324xf32>
    %26 = tpu.matmul %2, %25, %cst {dimension_numbers = #tpu.dot_dimension_numbers<[1], [0], [0], [1], [0, 0, 1, 1], [], []>} : vector<8x36xf32>, vector<36x324xf32>, vector<8x324xf32> -> vector<8x324xf32>
    %27 = vector.broadcast %4 : vector<8x1xf32> to vector<8x324xf32>
    %28 = arith.addf %26, %27 : vector<8x324xf32>
    %cst_26 = arith.constant 0.000000e+00 : f32
    %29 = vector.broadcast %cst_26 : f32 to vector<8x324xf32>
    %30 = arith.maximumf %28, %29 : vector<8x324xf32>
    %31 = vector.broadcast %0 : vector<1x324xf32> to vector<8x324xf32>
    %32 = arith.mulf %30, %31 : vector<8x324xf32>
    %cst_27 = arith.constant dense<0.000000e+00> : vector<8xf32>
    %33 = vector.multi_reduction <add>, %32, %cst_27 [1] : vector<8x324xf32> to vector<8xf32>
    %34 = vector.shape_cast %33 : vector<8xf32> to vector<8x1xf32>
    %cst_28 = arith.constant dense<0.000000e+00> : vector<8x1xf32>
    %35 = tpu.matmul %1, %34, %cst_28 {dimension_numbers = #tpu.dot_dimension_numbers<[1], [0], [0], [1], [0, 0, 1, 1], [], []>} : vector<8x8xf32>, vector<8x1xf32>, vector<8x1xf32> -> vector<8x1xf32>
    %cst_29 = arith.constant 9.765625E-4 : f32
    %36 = vector.broadcast %cst_29 : f32 to vector<8x1xf32>
    %37 = arith.mulf %35, %36 : vector<8x1xf32>
    %38 = vector.broadcast %37 : vector<8x1xf32> to vector<8x324xf32>
    %39 = arith.subf %32, %38 : vector<8x324xf32>
    %40 = vector.broadcast %0 : vector<1x324xf32> to vector<8x324xf32>
    %41 = arith.mulf %39, %40 : vector<8x324xf32>
    %42 = arith.mulf %41, %41 : vector<8x324xf32>
    %cst_30 = arith.constant dense<0.000000e+00> : vector<8xf32>
    %43 = vector.multi_reduction <add>, %42, %cst_30 [1] : vector<8x324xf32> to vector<8xf32>
    %44 = vector.shape_cast %43 : vector<8xf32> to vector<8x1xf32>
    %cst_31 = arith.constant dense<0.000000e+00> : vector<8x1xf32>
    %45 = tpu.matmul %1, %44, %cst_31 {dimension_numbers = #tpu.dot_dimension_numbers<[1], [0], [0], [1], [0, 0, 1, 1], [], []>} : vector<8x8xf32>, vector<8x1xf32>, vector<8x1xf32> -> vector<8x1xf32>
    %cst_32 = arith.constant 9.765625E-4 : f32
    %46 = vector.broadcast %cst_32 : f32 to vector<8x1xf32>
    %47 = arith.mulf %45, %46 : vector<8x1xf32>
    %cst_33 = arith.constant 9.99999974E-6 : f32
    %48 = vector.broadcast %cst_33 : f32 to vector<8x1xf32>
    %49 = arith.addf %47, %48 : vector<8x1xf32>
    %50 = math.rsqrt %49 : vector<8x1xf32>
    %51 = arith.mulf %50, %5 : vector<8x1xf32>
    %52 = vector.broadcast %51 : vector<8x1xf32> to vector<8x324xf32>
    %53 = arith.mulf %41, %52 : vector<8x324xf32>
    %54 = vector.broadcast %6 : vector<8x1xf32> to vector<8x324xf32>
    %55 = arith.addf %53, %54 : vector<8x324xf32>
    %cst_34 = arith.constant 0.000000e+00 : f32
    %56 = vector.broadcast %cst_34 : f32 to vector<8x362xf32>
    %c0_35 = arith.constant 0 : index
    %c0_36 = arith.constant 0 : index
    %57 = vector.load %arg9[%c0_35, %c0_36] : memref<8x362xf32, #tpu.memory_space<vmem>>, vector<8x362xf32>
    tpu.vector_store %arg9[%c0_35, %c0_36], %56 {strides = array<i32>} : memref<8x362xf32, #tpu.memory_space<vmem>>, vector<8x362xf32>,
    %58 = vector.broadcast %0 : vector<1x324xf32> to vector<8x324xf32>
    %59 = arith.mulf %55, %58 : vector<8x324xf32>
    %c0_37 = arith.constant 0 : index
    %c19_38 = arith.constant 19 : index
    %60 = vector.load %arg9[%c0_37, %c19_38] : memref<8x362xf32, #tpu.memory_space<vmem>>, vector<8x324xf32>
    tpu.vector_store %arg9[%c0_37, %c19_38], %59 {strides = array<i32>} : memref<8x362xf32, #tpu.memory_space<vmem>>, vector<8x324xf32>,
    %c0_39 = arith.constant 0 : index
    %c0_40 = arith.constant 0 : index
    %61 = vector.load %arg3[%c0_39, %c0_40] : memref<8x72xf32, #tpu.memory_space<vmem>>, vector<8x72xf32>
    %c0_41 = arith.constant 0 : index
    %c0_42 = arith.constant 0 : index
    %62 = vector.load %arg5[%c0_41, %c0_42] : memref<8x3xf32, #tpu.memory_space<vmem>>, vector<8x3xf32>
    %63 = vector.extract_strided_slice %62 {offsets = [0, 0], sizes = [8, 1], strides = [1, 1]} : vector<8x3xf32> to vector<8x1xf32>
    %64 = vector.extract_strided_slice %62 {offsets = [0, 1], sizes = [8, 1], strides = [1, 1]} : vector<8x3xf32> to vector<8x1xf32>
    %65 = vector.extract_strided_slice %62 {offsets = [0, 2], sizes = [8, 1], strides = [1, 1]} : vector<8x3xf32> to vector<8x1xf32>
    %c0_43 = arith.constant 0 : index
    %c0_44 = arith.constant 0 : index
    %66 = vector.load %arg9[%c0_43, %c0_44] : memref<8x362xf32, #tpu.memory_space<vmem>>, vector<8x324xf32>
    %c0_45 = arith.constant 0 : index
    %c1_46 = arith.constant 1 : index
    %67 = vector.load %arg9[%c0_45, %c1_46] : memref<8x362xf32, #tpu.memory_space<vmem>>, vector<8x324xf32>
    %c0_47 = arith.constant 0 : index
    %c2_48 = arith.constant 2 : index
    %68 = vector.load %arg9[%c0_47, %c2_48] : memref<8x362xf32, #tpu.memory_space<vmem>>, vector<8x324xf32>
    %c0_49 = arith.constant 0 : index
    %c18_50 = arith.constant 18 : index
    %69 = vector.load %arg9[%c0_49, %c18_50] : memref<8x362xf32, #tpu.memory_space<vmem>>, vector<8x324xf32>
    %c0_51 = arith.constant 0 : index
    %c19_52 = arith.constant 19 : index
    %70 = vector.load %arg9[%c0_51, %c19_52] : memref<8x362xf32, #tpu.memory_space<vmem>>, vector<8x324xf32>
    %c0_53 = arith.constant 0 : index
    %c20_54 = arith.constant 20 : index
    %71 = vector.load %arg9[%c0_53, %c20_54] : memref<8x362xf32, #tpu.memory_space<vmem>>, vector<8x324xf32>
    %c0_55 = arith.constant 0 : index
    %c36_56 = arith.constant 36 : index
    %72 = vector.load %arg9[%c0_55, %c36_56] : memref<8x362xf32, #tpu.memory_space<vmem>>, vector<8x324xf32>
    %c0_57 = arith.constant 0 : index
    %c37_58 = arith.constant 37 : index
    %73 = vector.load %arg9[%c0_57, %c37_58] : memref<8x362xf32, #tpu.memory_space<vmem>>, vector<8x324xf32>
    %c0_59 = arith.constant 0 : index
    %c38_60 = arith.constant 38 : index
    %74 = vector.load %arg9[%c0_59, %c38_60] : memref<8x362xf32, #tpu.memory_space<vmem>>, vector<8x324xf32>
    %75 = tpu.concatenate %66, %67, %68, %69, %70, %71, %72, %73, %74 in 0 : vector<8x324xf32>, vector<8x324xf32>, vector<8x324xf32>, vector<8x324xf32>, vector<8x324xf32>, vector<8x324xf32>, vector<8x324xf32>, vector<8x324xf32>, vector<8x324xf32> -> vector<72x324xf32>
    %cst_61 = arith.constant dense<0.000000e+00> : vector<8x324xf32>
    %76 = tpu.matmul %61, %75, %cst_61 {dimension_numbers = #tpu.dot_dimension_numbers<[1], [0], [0], [1], [0, 0, 1, 1], [], []>} : vector<8x72xf32>, vector<72x324xf32>, vector<8x324xf32> -> vector<8x324xf32>
    %77 = vector.broadcast %63 : vector<8x1xf32> to vector<8x324xf32>
    %78 = arith.addf %76, %77 : vector<8x324xf32>
    %cst_62 = arith.constant 0.000000e+00 : f32
    %79 = vector.broadcast %cst_62 : f32 to vector<8x324xf32>
    %80 = arith.maximumf %78, %79 : vector<8x324xf32>
    %81 = vector.broadcast %0 : vector<1x324xf32> to vector<8x324xf32>
    %82 = arith.mulf %80, %81 : vector<8x324xf32>
    %cst_63 = arith.constant dense<0.000000e+00> : vector<8xf32>
    %83 = vector.multi_reduction <add>, %82, %cst_63 [1] : vector<8x324xf32> to vector<8xf32>
    %84 = vector.shape_cast %83 : vector<8xf32> to vector<8x1xf32>
    %cst_64 = arith.constant dense<0.000000e+00> : vector<8x1xf32>
    %85 = tpu.matmul %1, %84, %cst_64 {dimension_numbers = #tpu.dot_dimension_numbers<[1], [0], [0], [1], [0, 0, 1, 1], [], []>} : vector<8x8xf32>, vector<8x1xf32>, vector<8x1xf32> -> vector<8x1xf32>
    %cst_65 = arith.constant 9.765625E-4 : f32
    %86 = vector.broadcast %cst_65 : f32 to vector<8x1xf32>
    %87 = arith.mulf %85, %86 : vector<8x1xf32>
    %88 = vector.broadcast %87 : vector<8x1xf32> to vector<8x324xf32>
    %89 = arith.subf %82, %88 : vector<8x324xf32>
    %90 = vector.broadcast %0 : vector<1x324xf32> to vector<8x324xf32>
    %91 = arith.mulf %89, %90 : vector<8x324xf32>
    %92 = arith.mulf %91, %91 : vector<8x324xf32>
    %cst_66 = arith.constant dense<0.000000e+00> : vector<8xf32>
    %93 = vector.multi_reduction <add>, %92, %cst_66 [1] : vector<8x324xf32> to vector<8xf32>
    %94 = vector.shape_cast %93 : vector<8xf32> to vector<8x1xf32>
    %cst_67 = arith.constant dense<0.000000e+00> : vector<8x1xf32>
    %95 = tpu.matmul %1, %94, %cst_67 {dimension_numbers = #tpu.dot_dimension_numbers<[1], [0], [0], [1], [0, 0, 1, 1], [], []>} : vector<8x8xf32>, vector<8x1xf32>, vector<8x1xf32> -> vector<8x1xf32>
    %cst_68 = arith.constant 9.765625E-4 : f32
    %96 = vector.broadcast %cst_68 : f32 to vector<8x1xf32>
    %97 = arith.mulf %95, %96 : vector<8x1xf32>
    %cst_69 = arith.constant 9.99999974E-6 : f32
    %98 = vector.broadcast %cst_69 : f32 to vector<8x1xf32>
    %99 = arith.addf %97, %98 : vector<8x1xf32>
    %100 = math.rsqrt %99 : vector<8x1xf32>
    %101 = arith.mulf %100, %64 : vector<8x1xf32>
    %102 = vector.broadcast %101 : vector<8x1xf32> to vector<8x324xf32>
    %103 = arith.mulf %91, %102 : vector<8x324xf32>
    %104 = vector.broadcast %65 : vector<8x1xf32> to vector<8x324xf32>
    %105 = arith.addf %103, %104 : vector<8x324xf32>
    %c0_70 = arith.constant 0 : index
    %c0_71 = arith.constant 0 : index
    %c0_72 = arith.constant 0 : index
    %106 = vector.load %arg8[%c0_70, %c0_71, %c0_72] : memref<1x8x324xf32, #tpu.memory_space<vmem>>, vector<1x8x324xf32>
    %107 = vector.shape_cast %106 : vector<1x8x324xf32> to vector<8x324xf32>
    %108 = vector.shape_cast %105 : vector<8x324xf32> to vector<1x8x324xf32>
    tpu.vector_store %arg8[%c0_70, %c0_71, %c0_72], %108 {strides = array<i32>} : memref<1x8x324xf32, #tpu.memory_space<vmem>>, vector<1x8x324xf32>,
    return
  }
  func.func @transform_0(%arg0: i32) -> (i32, i32, i32) {
    %c0_i32 = arith.constant 0 : i32
    %c0_i32_0 = arith.constant 0 : i32
    %c0_i32_1 = arith.constant 0 : i32
    return %arg0, %c0_i32, %c0_i32_0 : i32, i32, i32
  }
  func.func @transform_1(%arg0: i32) -> (i32, i32) {
    %c0_i32 = arith.constant 0 : i32
    %c0_i32_0 = arith.constant 0 : i32
    %c0_i32_1 = arith.constant 0 : i32
    return %c0_i32, %c0_i32_0 : i32, i32
  }
  func.func @transform_2(%arg0: i32) -> (i32, i32) {
    %c0_i32 = arith.constant 0 : i32
    %c0_i32_0 = arith.constant 0 : i32
    %c0_i32_1 = arith.constant 0 : i32
    return %c0_i32, %c0_i32_0 : i32, i32
  }
  func.func @transform_3(%arg0: i32) -> (i32, i32) {
    %c0_i32 = arith.constant 0 : i32
    %c0_i32_0 = arith.constant 0 : i32
    %c0_i32_1 = arith.constant 0 : i32
    return %c0_i32, %c0_i32_0 : i32, i32
  }
  func.func @transform_4(%arg0: i32) -> (i32, i32) {
    %c0_i32 = arith.constant 0 : i32
    %c0_i32_0 = arith.constant 0 : i32
    %c0_i32_1 = arith.constant 0 : i32
    return %c0_i32, %c0_i32_0 : i32, i32
  }
  func.func @transform_5(%arg0: i32) -> (i32, i32) {
    %c0_i32 = arith.constant 0 : i32
    %c0_i32_0 = arith.constant 0 : i32
    %c0_i32_1 = arith.constant 0 : i32
    return %c0_i32, %c0_i32_0 : i32, i32
  }
  func.func @transform_6(%arg0: i32) -> (i32, i32) {
    %c0_i32 = arith.constant 0 : i32
    %c0_i32_0 = arith.constant 0 : i32
    %c0_i32_1 = arith.constant 0 : i32
    return %c0_i32, %c0_i32_0 : i32, i32
  }
  func.func @transform_7(%arg0: i32) -> (i32, i32, i32) {
    %c0_i32 = arith.constant 0 : i32
    %c0_i32_0 = arith.constant 0 : i32
    %c0_i32_1 = arith.constant 0 : i32
    return %arg0, %c0_i32, %c0_i32_0 : i32, i32, i32
  }
}

</mosaic_0001>

<bundles_post_ra>
// kernel: tpu_custom_call.1
= control target key start
LH: loop header
LB: loop body
LE: loop exit
PB: predicated region body
PF: predicated region fallthrough
CT: control target
= control target key end

     0   :  { %12 = vsyncpa [#allocation4], 0  ;;  %s2117_s0 = inlined_call_operand.hbm [shape: f32[2,4,362], index: 0, kind: input, shape index: {}]   ;;  %s2118_s1 = inlined_call_operand.vmem [shape: f32[8,36], index: 1, kind: input, shape index: {}]   ;;  %s2119_s2 = inlined_call_operand.vmem [shape: f32[8,72], index: 2, kind: input, shape index: {}]   ;;  %s2120_s3 = inlined_call_operand.vmem [shape: f32[8,3], index: 3, kind: input, shape index: {}]   ;;  %s2121_s4 = inlined_call_operand.vmem [shape: f32[8,3], index: 4, kind: input, shape index: {}]   ;;  %s2122_s5 = inlined_call_operand.vmem [shape: f32[8,8], index: 5, kind: input, shape index: {}]   ;;  %s2123_s6 = inlined_call_operand.vmem [shape: f32[1,324], index: 6, kind: input, shape index: {}]   ;;  %s2124_s7 = inlined_call_operand.hbm [shape: f32[2,8,324], index: 7, kind: output, shape index: {}]  }
   0x1   :  { %14 = vsyncpa [#allocation4 + $0x1], 0 }
   0x2   :  { %15 = vsyncpa [#allocation5], 0 }
   0x3   :  { %17 = vsyncpa [#allocation5 + $0x1], 0  ;;  %s1774_s24 = smov 0   ;;  %s1776_s25 = smov 0  }
   0x4   :  { %s1778_s26 = smov 0   ;;  %s1780_s27 = smov 0  }
   0x5 LB: > { %s1795_s28 = sadd.s32 4294967295, %s1716_s27   ;;  %s1337_s29 = sadd.s32 4294967294, %s1716_s27   ;;  %s1716_s27 = sphi %s1780_s27, %s2138_s27   ;;  %s1712_s26 = sphi %s1778_s26, %s2137_s26   ;;  %s1708_s25 = sphi %s1776_s25, %s2136_s25   ;;  %s1704_s24 = sphi %s1774_s24, %s2135_s24  }
   0x6   : > { %s1799_s30 = sadd.s32 1, %s1716_s27   ;;  %s30_s8 = sadd.s32 1, %s1712_s26 }
   0x7   : > { %s27_s9 = ssub.s32 %s1716_s27, %s1799_s30  ;;  %p37_p0 = scmp.ne.s32.totalorder %s1712_s26, %s1708_s25 }
   0x8   : > { %p28_p1 = scmp.eq.s32.totalorder %s27_s9, 0  ;;  %p38_p2 = scmp.eq.s32.totalorder %s1716_s27, 0 }
   0x9   : > { %p43_p3 = scmp.ne.s32.totalorder %s1708_s25, %s1704_s24  ;;  %p44_p4 = scmp.eq.s32.totalorder %s1795_s28, 0 }
   0xa   : > { %s1811_s10 = scalar_select %p28_p1, %s1712_s26, %s30_s8  }
   0xb   : > { %p39_p5 = por %p38_p2, %p37_p0  ;;  %p1813_p6 = por %p44_p4, %p43_p3 }
   0xc   : > { %p193_p7 = scmp.eq.s32.totalorder %s1795_s28, 1  ;;  %p199_p8 = scmp.eq.s32.totalorder %s1337_s29, 1 }
   0xd   : > { %p1493_p10 = scmp.lt.s32.totalorder %s1716_s27, 2  ;;  %s237_s14 = sand.u32 1, %s1712_s26  }
   0xe   : > { %p1820_p11 = por %p193_p7, %p37_p0  ;;  %p1824_p12 = por %p199_p8, %p43_p3 }
   0xf   : > { %s1477_s15 = smul.u32 192, %s1716_s27  ;;  %p1835_p13 = pnand %p1493_p10, %p39_p5 }
  0x10   : > { %s2127_s12 = scalar_select %p1820_p11, 1, 0 }
  0x11   : > { %s2128_s13 = scalar_select %p1824_p12, 1, 0 }
  0x12   : > { %s1476_s16 = smul.u32 12, %s237_s14  ;;  %s1833_s19 = scalar_lea.hbm %s2117_s0, %s1477_s15 }
  0x13   : > { %s238_s23 = scalar_lea.sflag [#allocation4], %s237_s14  ;;  %s1620_s29 = scalar_lea.hbm %s1833_s19, 192 }
  0x14   : > { %s241_s21 = scalar_lea.vmem [#allocation3], %s1476_s16  ;;  %p1621_p2 = scmp.ne.s32.totalorder %s1833_s19, %s1620_s29 }
  0x15   : > { %s249_s22 = sshll.u32 %s241_s21, 4  ;;  %p1622_p3 = pneg %p1835_p13  ;;  %s1840_s22 = int_to_ptr.vmem [resolvable:$true] %s249_s22 }
  0x16   : > { %s1625_s15 = scalar_lea.hbm %s2117_s0, 384  ;;  %p1626_p7 = scmp.lt.u32.totalorder %s1833_s19, %s2117_s0 }
  0x17   : > { %p1623_p4 = pnand %p1622_p3, %p1621_p2  ;;  %p1627_p8 = scmp.lt.u32.totalorder %s1625_s15, %s1620_s29 }
  0x18   : > { %p1629_p9 = scmp.lt.u32.totalorder %s1620_s29, %s1833_s19 }
  0x19   : > { %p1624_p5 = pneg %p1623_p4  ;;  %p1628_p10 = por %p1627_p8, %p1626_p7 }
  0x1b   : > { %p1630_p0 = por %p1629_p9, %p1628_p10 }
  0x1d   : > { %p1631_p1 = pnand %p1630_p0, %p1624_p5 }
  0x1f   : > { %1634 = shalt.err (!%p1631_p1)
}
  0x20   : > { %s1635_s14 = scalar_lea.vmem %s1840_s22, 192  ;;  %s1718_s16 = smov [#allocation3]  }
  0x21   : > { %p1636_p2 = scmp.ne.s32.totalorder %s1840_s22, %s1635_s14  ;;  %s1640_s21 = sshll.u32 %s1718_s16, 4  ;;  %s1641_s21 = int_to_ptr.vmem [resolvable:$false] %s1640_s21 }
  0x22   : > { %s1642_s8 = scalar_lea.vmem %s1641_s21, 384  ;;  %p1643_p11 = scmp.lt.s32.totalorder %s1840_s22, %s1641_s21 }
  0x23   : > { %p1638_p4 = pnand %p1636_p2, %p1622_p3  ;;  %p1644_p7 = scmp.lt.s32.totalorder %s1642_s8, %s1635_s14 }
  0x25   : > { %p1639_p12 = pneg %p1638_p4  ;;  %p1645_p8 = por %p1644_p7, %p1643_p11 }
  0x27   : > { %p1646_p9 = pnand %p1645_p8, %p1639_p12 }
  0x29   : > { %1649 = shalt.err (!%p1646_p9)
}
  0x2a   : > { %1488 = dma.hbm_to_vmem [thread:$0]  (!%p1835_p13), %s1833_s19, 192, %s1840_s22, %s238_s23  }
  0x2b   : > { %p2130_p0 = scmp.lt.s32.totalorder %s1716_s27, 3  ;;  %p2131_p1 = scmp.ge.s32.totalorder %s1716_s27, 1 }
  0x2d   : > { %p255_p3 = pnand %p2131_p1, %p2130_p0 }
  0x2e   : > { %s1873_s29 = sand.u32 (!%p255_p3), 1, %s1708_s25  }
  0x2f   : > { %258 = sbr.rel (%p255_p3) target bundleno = 2942 (0xb7e), region = 48  ;;  %s261_s15 = scalar_lea.sflag (!%p255_p3), [#allocation4], %s1873_s29 }
  0x30   : > { %s1478_s9 = smul.u32 (!%p255_p3), 12, %s1873_s29 }
  0x32   : > { %s264_s17 = scalar_lea.vmem (!%p255_p3), [#allocation3], %s1478_s9 }
  0x36   : > { %1695 = dma.done.wait (%p1813_p6), %s261_s15, 192  }
  0x37   : > { %1697 = vsyncadd (%p1813_p6), %s261_s15, 4294967104  ;;  %v1881_v0 = vld [vmem:[%s264_s17] sm:$0xff]  ;;  %v300_v1 = vld [vmem:[%s264_s17 + $0x8] sm:$0xf]  ;;  %v1719_v2 = vmov 0.0|0.0   ;;  %s1720_s19 = smov 126  }
  0x38   : > { %1442 = vmatprep.subr.bf16.mxu1 %v1719_v2  ;;  %319 = vrot.lane.b32.xlu0 %v1881_v0, %s1720_s19  ;;  %v306_v3 = vcombine.low %v300_v1, %v300_v1  ;;  %v303_v4 = vcombine.high %v1881_v0, %v1881_v0  ;;  %s1721_s20 = smov 110   ;;  %s1722_s11 = smov 127   ;;  %v305_v6 = vcombine.low %v1881_v0, %v1881_v0  ;;  %v1727_v8 = vmov 0.0   ;;  %v1917_v10 = vld [vmem:[%s2120_s3] sm:$0xff] }
  0x39   : > { %s1723_s22 = smov 109   ;;  %s1724_s23 = smov 108   ;;  %783 = vst [vmem:[#allocation2] sm:$0xff] %v1727_v8  ;;  %492 = vmatprep.mubr.f32.mxu0 %v1727_v8  ;;  %vm1728_vm0 = vmmov 0   ;;  %v1729_v9 = vmov 0   ;;  %vm313_vm1 = vcmask 1039360  }
  0x3a   : > { %v1551_v5 = vpack.i.bf16 %v306_v3, %v1881_v0  ;;  %v1546_v7 = vpack.i.bf16 %v300_v1, %v303_v4  ;;  %s1725_s18 = smov 92   ;;  %s1726_s14 = smov 91   ;;  %1390 = vmatprep.mubr.msk.f32.mxu1 %vm1728_vm0, %v1727_v8  ;;  %1576 = vset.pattern.permute.xlu1 %v1729_v9  ;;  %vm400_vm2 = vcmask 1043456   ;;  %vm337_vm3 = vcmask 900096  }
  0x3b   : > { %s1730_s16 = smov 90   ;;  %vm325_vm4 = vcmask 1031168   ;;  %vm349_vm5 = vcmask 891904   ;;  %vm361_vm6 = vcmask 883712   ;;  %vm373_vm7 = vcmask 752640   ;;  %s1732_s15 = smov 19  }
  0x3c   : > { %1552 = vrot.lane.b32.xlu1 %v1551_v5, %s1721_s20  ;;  %1542 = vrot.lane.b32.xlu0 %v1551_v5, %s1722_s11  ;;  %vm385_vm8 = vcmask 744448   ;;  %vm397_vm9 = vcmask 736256   ;;  %vm418_vm10 = vcmask 293888   ;;  %vm592_vm11 = vcmask 556032   ;;  %p2132_p11 = scmp.ne.s32.totalorder %s2127_s12, 0 }
  0x3d   : > { %vm597_vm12 = vcmask 64512   ;;  %vm785_vm13 = vcmask 867328   ;;  %vm799_vm14 = vcmask 154624   ;;  %vm805_vm15 = vcmask 1047704  }
  0x3e   : > { %786 = vst.msk [vmem:[#allocation2 + $0x10] sm:$0xff] %vm785_vm13, %v1727_v8 }
  0x40   : > { %307 = vrot.lane.b32.xlu1 %v305_v6, %s1722_s11  ;;  %1547 = vrot.lane.b32.xlu0 %v1546_v7, %s1720_s19 }
  0x44   : > { %331 = vrot.lane.b32.xlu1 %v305_v6, %s1721_s20  ;;  %1557 = vrot.lane.b32.xlu0 %v1546_v7, %s1723_s22 }
  0x48   : > { %1562 = vrot.lane.b32.xlu1 %v1551_v5, %s1724_s23  ;;  %1567 = vrot.lane.b32.xlu0 %v1546_v7, %s1725_s18 }
  0x4c   : > { %1572 = vrot.lane.b32.xlu1 %v1551_v5, %s1726_s14  ;;  %343 = vrot.lane.b32.xlu0 %v1881_v0, %s1723_s22 }
  0x50   : > { %355 = vrot.lane.b32.xlu1 %v305_v6, %s1724_s23  ;;  %367 = vrot.lane.b32.xlu0 %v1881_v0, %s1725_s18 }
  0x54   : > { %379 = vrot.lane.b32.xlu1 %v305_v6, %s1726_s14  ;;  %393 = vrot.lane.b32.xlu0 %v303_v4, %s1730_s16 }
  0x58   : > { %395 = vrot.lane.b32.xlu1 %v300_v1, %s1730_s16  ;;  %391 = vrot.lane.b32.xlu0 %v1881_v0, %s1730_s16 }
  0x5c   : > { %415 = vperm.xlu1 %1576, %v1917_v10  }
  0xaa   : > { %v320_v11 = vpop.permute.xlu0 %319 }
  0xae   : > { %v1553_v12 = vpop.permute.xlu1 %1552  ;;  %v1543_v13 = vpop.permute.xlu0 %1542 }
  0xaf   : > { %v1545_v14 = vunpack.i.h.bf16 %v1543_v13  ;;  %v1544_v15 = vunpack.i.l.bf16 %v1543_v13  ;;  %v1555_v16 = vunpack.i.h.bf16 %v1553_v12  ;;  %v1554_v17 = vunpack.i.l.bf16 %v1553_v12 }
  0xb1   : > { %v315_v18 = vsel %vm313_vm1, %v1544_v15, %v1545_v14  ;;  %v403_v23 = vsel %vm400_vm2, %v300_v1, %v1545_v14  ;;  %v339_v28 = vsel %vm337_vm3, %v1554_v17, %v1555_v16 }
  0xb2   : > { %v308_v19 = vpop.permute.xlu1 %307  ;;  %v1548_v20 = vpop.permute.xlu0 %1547  ;;  %v402_v24 = vsel %vm400_vm2, %v303_v4, %v315_v18 }
  0xb3   : > { %v1550_v21 = vunpack.i.h.bf16 %v1548_v20  ;;  %v1549_v22 = vunpack.i.l.bf16 %v1548_v20  ;;  %v314_v25 = vsel %vm313_vm1, %v308_v19, %v1544_v15  ;;  %v295_v20 = vld [vmem:[%s2123_s6] sm:$0x7] }
  0xb4   : > { %v401_v36 = vsel %vm400_vm2, %v1881_v0, %v314_v25 }
  0xb5   : > { %v406_v26 = vsel %vm400_vm2, %v1550_v21, %v1555_v16  ;;  %v327_v27 = vsel %vm325_vm4, %v1549_v22, %v1550_v21  ;;  %v326_v35 = vsel %vm325_vm4, %v320_v11, %v1549_v22  ;;  %v297_v11 = vld [vmem:[%s2118_s1] sm:$0xff]  ;;  %v573_v16 = vlaneseq }
  0xb6   : > { %v332_v29 = vpop.permute.xlu1 %331  ;;  %v1558_v30 = vpop.permute.xlu0 %1557  ;;  %v1443_v31 = vpack.c.bf16 %v406_v26, %v403_v23  ;;  %v405_v32 = vsel %vm400_vm2, %v327_v27, %v339_v28 }
  0xb7   : > { %v338_v33 = vsel %vm337_vm3, %v332_v29, %v1554_v17  ;;  %v1434_v34 = vpack.c.bf16 %v405_v32, %v402_v24  ;;  %v1560_v39 = vunpack.i.h.bf16 %v1558_v30  ;;  %v1559_v40 = vunpack.i.l.bf16 %v1558_v30 }
  0xb8   : > { %1444 = vmatpush3.bf16.msra.mxu1 %v1443_v31  ;;  %v404_v37 = vsel %vm400_vm2, %v326_v35, %v338_v33  ;;  %v574_v17 = vshrl.u32 %v573_v16, 7 }
  0xb9   : > { %1435 = vmatprep.subr.bf16.mxu0 %v1434_v34  ;;  %v1436_v38 = vpack.c.bf16 %v404_v37, %v401_v36  ;;  %1445 = vmatprep.subr.bf16.mxu1 %v1719_v2  ;;  %v351_v49 = vsel %vm349_vm5, %v1559_v40, %v1560_v39 }
  0xba   : > { %v1563_v41 = vpop.permute.xlu1 %1562  ;;  %v1568_v42 = vpop.permute.xlu0 %1567  ;;  %v583_v19 = vsub.s32 2, %v574_v17  ;;  %v575_v22 = vsub.s32 0, %v574_v17  ;;  %v579_v25 = vsub.s32 1, %v574_v17 }
  0xbb   : > { %v1565_v43 = vunpack.i.h.bf16 %v1563_v41  ;;  %v1564_v44 = vunpack.i.l.bf16 %v1563_v41  ;;  %v1570_v45 = vunpack.i.h.bf16 %v1568_v42  ;;  %v1569_v46 = vunpack.i.l.bf16 %v1568_v42  ;;  %1437 = vmatpush1.bf16.msra.mxu0 %v1436_v38  ;;  %v1981_v42 = vld [vmem:[%s2122_s5] sm:$0xff] }
  0xbc   : > { %v1966_v27 = vrot.slane %v295_v20, %v583_v19  ;;  %v1968_v30 = vrot.slane %v295_v20, %v575_v22  ;;  %v1970_v33 = vrot.slane %v295_v20, %v579_v25 }
  0xbd   : > { %v363_v52 = vsel %vm361_vm6, %v1564_v44, %v1565_v43  ;;  %v375_v53 = vsel %vm373_vm7, %v1569_v46, %v1570_v45  ;;  %v409_v55 = vsel %vm400_vm2, %v1560_v39, %v1565_v43 }
  0xbe   : > { %v1573_v47 = vpop.permute.xlu1 %1572  ;;  %v344_v48 = vpop.permute.xlu0 %343  ;;  %v408_v60 = vsel %vm400_vm2, %v351_v49, %v363_v52 }
  0xbf   : > { %v1575_v50 = vunpack.i.h.bf16 %v1573_v47  ;;  %v1574_v51 = vunpack.i.l.bf16 %v1573_v47  ;;  %v350_v3 = vsel %vm349_vm5, %v344_v48, %v1559_v40 }
  0xc1   : > { %v387_v54 = vsel %vm385_vm8, %v1574_v51, %v1575_v50  ;;  %v412_v56 = vsel %vm400_vm2, %v1570_v45, %v1575_v50 }
  0xc2   : > { %v356_v57 = vpop.permute.xlu1 %355  ;;  %v368_v58 = vpop.permute.xlu0 %367  ;;  %v1446_v59 = vpack.c.bf16 %v412_v56, %v409_v55  ;;  %v411_v61 = vsel %vm400_vm2, %v375_v53, %v387_v54 }
  0xc3   : > { %v1438_v62 = vpack.c.bf16 %v411_v61, %v408_v60  ;;  %v362_v63 = vsel %vm361_vm6, %v356_v57, %v1564_v44  ;;  %v374_v4 = vsel %vm373_vm7, %v368_v58, %v1569_v46  ;;  %v1731_v61 = vmov 2  }
  0xc4   : > { %1447 = vmatpush3.bf16.msra.mxu1 %v1446_v59  ;;  %v407_v6 = vsel %vm400_vm2, %v350_v3, %v362_v63  ;;  %1577 = vset.pattern.permute.xlu0 %v1731_v61 }
  0xc5   : > { %1439 = vmatprep.subr.bf16.mxu0 %v1438_v62  ;;  %1388 = vmatprep.subr.mxu1 %v1727_v8 }
  0xc6   : > { %v380_v0 = vpop.permute.xlu1 %379  ;;  %v394_v1 = vpop.permute.xlu0 %393 }
  0xc7   : > { %v386_v5 = vsel %vm385_vm8, %v380_v0, %v1574_v51 }
  0xc8   : > { %v410_v7 = vsel %vm400_vm2, %v374_v4, %v386_v5 }
  0xc9   : > { %v1440_v9 = vpack.c.bf16 %v410_v7, %v407_v6 }
  0xca   : > { %v396_v12 = vpop.permute.xlu1 %395  ;;  %v392_v14 = vpop.permute.xlu0 %391 }
  0xcb   : > { %v399_v13 = vsel %vm397_vm9, %v394_v1, %v396_v12  ;;  %1441 = vmatpush1.bf16.msra.mxu0 %v1440_v9  ;;  %1389 = vmatpush3.msk.msra.mxu1 %vm400_vm2, %v396_v12  ;;  %v398_v15 = vsel %vm397_vm9, %v392_v14, %v394_v1 }
  0xcc   : > { %1342 = vmatprep.subr.msk.mxu0 %vm400_vm2, %v399_v13  ;;  %1391 = vmatmul.mubr.msk.f32.vlgmr.msra.gmra.mrb[0].mxu1 %vm418_vm10, %v297_v11 }
  0xcd   : > { %1398 = vmatprep.subr.mxu1 %v1727_v8  ;;  %1400 = vmatprep.mubr.msk.f32.mxu1 %vm1728_vm0, %v1727_v8 }
  0xcf   : > { %1343 = vmatpush1.msk.msra.mxu0 %vm400_vm2, %v398_v15  ;;  %vm808_vm2 = vcmask 711680  }
  0xd0   : > { %1344 = vmatmul.mubr.msk.f32.vlgmr.msra.gmra.mrb[0].mxu0 %vm418_vm10, %v297_v11  ;;  %1393 = vmatprep.subr.mxu0 %v1727_v8 }
  0xd1   : > { %1395 = vmatprep.mubr.msk.f32.mxu0 %vm1728_vm0, %v1727_v8 }
  0xdb   : > { %v416_v18 = vpop.permute.xlu1 %415 }
 0x19f   : > { %v565_v21 = vpop.f32.mrb[0].mxu1 }
 0x1a0   : > { %v566_v23 = vadd.f32 %v565_v21, %v416_v18  ;;  %v1392_v24 = vpop.f32.mrb[1].mxu1 }
 0x1a2   : > { %v571_v26 = vmax.f32 %v566_v23, 0.0 }
 0x1a3   : > { %v494_v28 = vpop.f32.mrb[0].mxu0 }
 0x1a4   : > { %v495_v29 = vadd.f32 %v494_v28, %v416_v18  ;;  %v496_v31 = vpop.f32.mrb[1].mxu0  ;;  %v590_v35 = vmul.f32 %v1966_v27, %v571_v26  ;;  %v2019_v26 = vld [vmem:[%s2121_s4] sm:$0xff] }
 0x1a5   : > { %v497_v32 = vadd.f32 %v496_v31, %v416_v18 }
 0x1a6   : > { %v569_v34 = vmax.f32 %v495_v29, 0.0  ;;  %v593_v39 = vsel %vm592_vm11, %v590_v35, 0.0 }
 0x1a7   : > { %v570_v36 = vmax.f32 %v497_v32, 0.0 }
 0x1a8   : > { %v588_v37 = vmul.f32 %v1968_v30, %v569_v34 }
 0x1a9   : > { %v589_v38 = vmul.f32 %v1970_v33, %v570_v36 }
 0x1ab   : > { %v591_v40 = vadd.f32 %v589_v38, %v588_v37 }
 0x1ad   : > { %v594_v41 = vadd.f32 %v593_v39, %v591_v40 }
 0x1af   : > { %595 = vadd.xlane.f32.xlu0 %v594_v41 }
 0x1c5   : > { %764 = vrot.lane.b32.xlu0 %v1917_v10, %s1722_s11 }
 0x1c9   : > { %777 = vperm.xlu0 %1577, %v1917_v10  }
 0x23c   : > { %v596_v43 = vpop.xlane.xlu0 %595 }
 0x23d   : > { %1394 = vmatpush3.msra.mxu0 %v596_v43 }
 0x23e   : > { %1396 = vmatmul.mubr.msk.f32.vlgmr.msra.gmra.mrb[2].mxu0 %vm597_vm12, %v1981_v42 }
 0x23f   : > { %979 = vmatprep.mubr.f32.mxu0 %v1727_v8 }
 0x240   : > { %v765_v3 = vpop.permute.xlu0 %764 }
 0x248   : > { %v778_v7 = vpop.permute.xlu0 %777 }
 0x311   : > { %v667_v44 = vpop.f32.mrb[2].mxu0 }
 0x312   : > { %v671_v45 = vmul.f32 0.0009765625, %v667_v44  ;;  %v1397_v46 = vpop.f32.mrb[3].mxu0 }
 0x314   : > { %674 = vperm.xlu1 %1576, %v671_v45  }
 0x393   : > { %v675_v47 = vpop.permute.xlu1 %674 }
 0x394   : > { %v677_v48 = vsub.f32 %v588_v37, %v675_v47  ;;  %v678_v49 = vsub.f32 %v589_v38, %v675_v47  ;;  %v679_v50 = vsub.f32 %v590_v35, %v675_v47 }
 0x396   : > { %v680_v51 = vmul.f32 %v677_v48, %v1968_v30  ;;  %v681_v52 = vmul.f32 %v678_v49, %v1970_v33  ;;  %v682_v53 = vmul.f32 %v679_v50, %v1966_v27 }
 0x398   : > { %v683_v54 = vmul.f32 %v680_v51, %v680_v51  ;;  %v684_v55 = vmul.f32 %v681_v52, %v681_v52  ;;  %v685_v56 = vmul.f32 %v682_v53, %v682_v53 }
 0x39a   : > { %v686_v57 = vadd.f32 %v684_v55, %v683_v54  ;;  %v687_v58 = vsel %vm592_vm11, %v685_v56, 0.0 }
 0x39c   : > { %v688_v59 = vadd.f32 %v687_v58, %v686_v57 }
 0x39e   : > { %689 = vadd.xlane.f32.xlu1 %v688_v59 }
 0x42b   : > { %v690_v60 = vpop.xlane.xlu1 %689 }
 0x42c   : > { %1399 = vmatpush3.msra.mxu1 %v690_v60 }
 0x42d   : > { %1401 = vmatmul.mubr.msk.f32.vlgmr.msra.gmra.mrb[2].mxu1 %vm597_vm12, %v1981_v42  ;;  %1464 = vmatprep.subr.bf16.mxu1 %v1719_v2 }
 0x42e   : > { %1421 = vmatprep.mubr.msk.f32.mxu1 %vm1728_vm0, %v1727_v8 }
 0x500   : > { %v757_v62 = vpop.f32.mrb[2].mxu1 }
 0x501   : > { %v761_v63 = vmul.f32 0.0009765625, %v757_v62  ;;  %v1402_v0 = vpop.f32.mrb[3].mxu1 }
 0x503   : > { %v762_v1 = vadd.f32 1e-05, %v761_v63 }
 0x505   : > { %1616 = vrsqrt.f32 %v762_v1 }
 0x50f   : > { %v1617_v4 = vpop.eup %1616 }
 0x510   : > { %v767_v5 = vmul.f32 %v1617_v4, %v765_v3 }
 0x512   : > { %770 = vperm.xlu1 %1576, %v767_v5  }
 0x591   : > { %v771_v6 = vpop.permute.xlu1 %770 }
 0x592   : > { %v773_v9 = vmul.f32 %v771_v6, %v680_v51  ;;  %v774_v11 = vmul.f32 %v771_v6, %v681_v52  ;;  %v775_v12 = vmul.f32 %v771_v6, %v682_v53 }
 0x594   : > { %v780_v13 = vadd.f32 %v778_v7, %v773_v9  ;;  %v781_v14 = vadd.f32 %v778_v7, %v774_v11  ;;  %v782_v10 = vadd.f32 %v778_v7, %v775_v12 }
 0x596   : > { %v788_v15 = vmul.f32 %v781_v14, %v1970_v33  ;;  %v787_v16 = vmul.f32 %v780_v13, %v1968_v30  ;;  %v789_v17 = vmul.f32 %v782_v10, %v1966_v27 }
 0x598   : > { %795 = vrot.lane.b32.xlu0 %v788_v15, %s1732_s15  ;;  %793 = vrot.lane.b32.xlu1 %v787_v16, %s1732_s15 }
 0x59c   : > { %797 = vrot.lane.b32.xlu1 %v789_v17, %s1732_s15  ;;  %s1733_s15 = smov [#allocation6]  }
 0x59d   : > { %s1654_s17 = sshll.u32 %s1733_s15, 4  ;;  %s1655_s17 = int_to_ptr.vmem [resolvable:$false] %s1654_s17 }
 0x60a   : > { %v796_v18 = vpop.permute.xlu0 %795  ;;  %v794_v19 = vpop.permute.xlu1 %793 }
 0x60b   : > { %v800_v20 = vsel %vm799_vm14, %v794_v19, %v796_v18  ;;  %806 = vst.msk [vmem:[#allocation2] sm:$0xff] %vm805_vm15, %v794_v19 }
 0x60e   : > { %v798_v21 = vpop.permute.xlu1 %797 }
 0x60f   : > { %v801_v22 = vsel %vm799_vm14, %v796_v18, %v798_v21 }
 0x610   : > { %809 = vst.msk [vmem:[#allocation2 + $0x10] sm:$0xff] %vm808_vm2, %v801_v22 }
 0x612   : > { %v812_v23 = vld [vmem:[#allocation2] sm:$0xff] }
 0x613   : > { %829 = vrot.lane.b32.xlu0 %v812_v23, %s1720_s19  ;;  %818 = vrot.lane.b32.xlu1 %v812_v23, %s1722_s11 }
 0x617   : > { %851 = vrot.lane.b32.xlu0 %v812_v23, %s1723_s22  ;;  %840 = vrot.lane.b32.xlu1 %v812_v23, %s1721_s20  ;;  %v814_v24 = vld [vmem:[#allocation2 + $0x10] sm:$0xff] }
 0x618   : > { %v1588_v25 = vpack.i.bf16 %v814_v24, %v800_v20 }
 0x61b   : > { %873 = vrot.lane.b32.xlu0 %v812_v23, %s1725_s18  ;;  %862 = vrot.lane.b32.xlu1 %v812_v23, %s1724_s23 }
 0x61f   : > { %1589 = vrot.lane.b32.xlu1 %v1588_v25, %s1721_s20  ;;  %1579 = vrot.lane.b32.xlu0 %v1588_v25, %s1722_s11  ;;  %s1656_s20 = scalar_lea.vmem %s1655_s17, 768 }
 0x623   : > { %1599 = vrot.lane.b32.xlu1 %v1588_v25, %s1724_s23  ;;  %1584 = vrot.lane.b32.xlu0 %v1588_v25, %s1720_s19  ;;  %s1480_s23 = smul.u32 384, %s1795_s28  ;;  %s1253_s28 = scalar_lea.sflag [#allocation5], %s1873_s29 }
 0x625   : > { %s2072_s8 = scalar_lea.hbm %s2124_s7, %s1480_s23 }
 0x627   : > { %1609 = vrot.lane.b32.xlu1 %v1588_v25, %s1726_s14  ;;  %1594 = vrot.lane.b32.xlu0 %v1588_v25, %s1723_s22 }
 0x62b   : > { %884 = vrot.lane.b32.xlu1 %v812_v23, %s1726_s14  ;;  %1604 = vrot.lane.b32.xlu0 %v1588_v25, %s1725_s18  ;;  %v810_v25 = vld [vmem:[%s2119_s2] sm:$0xff] }
 0x62f   : > { %899 = vrot.lane.b32.xlu1 %v814_v24, %s1730_s16  ;;  %897 = vrot.lane.b32.xlu0 %v800_v20, %s1730_s16 }
 0x633   : > { %908 = vperm.xlu1 %1576, %v2019_v26   ;;  %895 = vrot.lane.b32.xlu0 %v812_v23, %s1730_s16 }
 0x685   : > { %v830_v28 = vpop.permute.xlu0 %829  ;;  %v819_v29 = vpop.permute.xlu1 %818 }
 0x689   : > { %v852_v31 = vpop.permute.xlu0 %851  ;;  %v841_v32 = vpop.permute.xlu1 %840 }
 0x68d   : > { %v874_v34 = vpop.permute.xlu0 %873  ;;  %v863_v35 = vpop.permute.xlu1 %862 }
 0x691   : > { %v1580_v36 = vpop.permute.xlu0 %1579  ;;  %v1590_v37 = vpop.permute.xlu1 %1589 }
 0x692   : > { %v1582_v38 = vunpack.i.h.bf16 %v1580_v36  ;;  %v1581_v39 = vunpack.i.l.bf16 %v1580_v36  ;;  %v1592_v40 = vunpack.i.h.bf16 %v1590_v37  ;;  %v1591_v41 = vunpack.i.l.bf16 %v1590_v37 }
 0x694   : > { %v1465_v43 = vpack.c.bf16 %v1582_v38, %v814_v24  ;;  %v824_v44 = vsel %vm313_vm1, %v819_v29, %v1581_v39  ;;  %v825_v45 = vsel %vm313_vm1, %v1581_v39, %v1582_v38  ;;  %v846_v52 = vsel %vm337_vm3, %v841_v32, %v1591_v41 }
 0x695   : > { %v1450_v46 = vpack.c.bf16 %v824_v44, %v812_v23  ;;  %v1585_v47 = vpop.permute.xlu0 %1584  ;;  %v1600_v48 = vpop.permute.xlu1 %1599  ;;  %v1448_v49 = vpack.c.bf16 %v825_v45, %v800_v20  ;;  %v847_v54 = vsel %vm337_vm3, %v1591_v41, %v1592_v40  ;;  %vm911_vm1 = vcmask 588800  }
 0x696   : > { %v1587_v50 = vunpack.i.h.bf16 %v1585_v47  ;;  %v1586_v51 = vunpack.i.l.bf16 %v1585_v47  ;;  %1466 = vmatpush3.bf16.msra.mxu1 %v1465_v43  ;;  %v1601_v53 = vunpack.i.l.bf16 %v1600_v48  ;;  %v1602_v57 = vunpack.i.h.bf16 %v1600_v48 }
 0x697   : > { %1449 = vmatprep.subr.bf16.mxu0 %v1448_v49  ;;  %1467 = vmatprep.subr.bf16.mxu1 %v1719_v2 }
 0x698   : > { %v835_v55 = vsel %vm325_vm4, %v830_v28, %v1586_v51  ;;  %v1468_v56 = vpack.c.bf16 %v1592_v40, %v1587_v50  ;;  %1451 = vmatpush1.bf16.msra.mxu0 %v1450_v46  ;;  %v836_v58 = vsel %vm325_vm4, %v1586_v51, %v1587_v50  ;;  %v868_v1 = vsel %vm361_vm6, %v863_v35, %v1601_v53 }
 0x699   : > { %v1454_v59 = vpack.c.bf16 %v846_v52, %v835_v55  ;;  %v1595_v60 = vpop.permute.xlu0 %1594  ;;  %v1610_v61 = vpop.permute.xlu1 %1609  ;;  %v1452_v62 = vpack.c.bf16 %v847_v54, %v836_v58  ;;  %v869_v9 = vsel %vm361_vm6, %v1601_v53, %v1602_v57 }
 0x69a   : > { %v1597_v63 = vunpack.i.h.bf16 %v1595_v60  ;;  %v1596_v0 = vunpack.i.l.bf16 %v1595_v60  ;;  %1469 = vmatpush3.bf16.msra.mxu1 %v1468_v56  ;;  %v1612_v3 = vunpack.i.h.bf16 %v1610_v61  ;;  %v1611_v4 = vunpack.i.l.bf16 %v1610_v61 }
 0x69b   : > { %1453 = vmatprep.subr.bf16.mxu0 %v1452_v62  ;;  %1470 = vmatprep.subr.bf16.mxu1 %v1719_v2 }
 0x69c   : > { %v857_v5 = vsel %vm349_vm5, %v852_v31, %v1596_v0  ;;  %v1471_v6 = vpack.c.bf16 %v1602_v57, %v1597_v63  ;;  %1455 = vmatpush1.bf16.msra.mxu0 %v1454_v59  ;;  %v858_v7 = vsel %vm349_vm5, %v1596_v0, %v1597_v63  ;;  %v891_v16 = vsel %vm385_vm8, %v1611_v4, %v1612_v3 }
 0x69d   : > { %v1458_v11 = vpack.c.bf16 %v868_v1, %v857_v5  ;;  %v1605_v12 = vpop.permute.xlu0 %1604  ;;  %v885_v13 = vpop.permute.xlu1 %884  ;;  %v1456_v14 = vpack.c.bf16 %v869_v9, %v858_v7 }
 0x69e   : > { %v1607_v10 = vunpack.i.h.bf16 %v1605_v12  ;;  %v1606_v15 = vunpack.i.l.bf16 %v1605_v12  ;;  %1472 = vmatpush3.bf16.msra.mxu1 %v1471_v6  ;;  %v890_v19 = vsel %vm385_vm8, %v885_v13, %v1611_v4 }
 0x69f   : > { %1457 = vmatprep.subr.bf16.mxu0 %v1456_v14  ;;  %1473 = vmatprep.subr.bf16.mxu1 %v1719_v2 }
 0x6a0   : > { %v1474_v17 = vpack.c.bf16 %v1612_v3, %v1607_v10  ;;  %v879_v18 = vsel %vm373_vm7, %v874_v34, %v1606_v15  ;;  %1459 = vmatpush1.bf16.msra.mxu0 %v1458_v11  ;;  %v880_v20 = vsel %vm373_vm7, %v1606_v15, %v1607_v10 }
 0x6a1   : > { %v1462_v21 = vpack.c.bf16 %v890_v19, %v879_v18  ;;  %v898_v22 = vpop.permute.xlu0 %897  ;;  %v900_v23 = vpop.permute.xlu1 %899  ;;  %v1460_v24 = vpack.c.bf16 %v891_v16, %v880_v20 }
 0x6a2   : > { %1475 = vmatpush3.bf16.msra.mxu1 %v1474_v17  ;;  %v902_v2 = vsel %vm397_vm9, %v898_v22, %v900_v23 }
 0x6a3   : > { %1461 = vmatprep.subr.bf16.mxu0 %v1460_v24  ;;  %1419 = vmatprep.subr.mxu1 %v1727_v8 }
 0x6a4   : > { %1463 = vmatpush1.bf16.msra.mxu0 %v1462_v21 }
 0x6a5   : > { %v896_v28 = vpop.permute.xlu0 %895  ;;  %931 = vmatprep.subr.mxu0 %v902_v2 }
 0x6a6   : > { %v901_v29 = vsel %vm397_vm9, %v896_v28, %v898_v22  ;;  %1420 = vmatpush3.msra.mxu1 %v900_v23 }
 0x6a7   : > { %1422 = vmatmul.mubr.msk.f32.vlgmr.msra.gmra.mrb[4].mxu1 %vm911_vm1, %v810_v25  ;;  %1429 = vmatprep.subr.mxu1 %v1727_v8 }
 0x6a8   : > { %932 = vmatpush1.msra.mxu0 %v901_v29  ;;  %1431 = vmatprep.mubr.msk.f32.mxu1 %vm1728_vm0, %v1727_v8 }
 0x6a9   : > { %1349 = vmatmul.mubr.msk.f32.vlgmr.msra.gmra.mrb[4].mxu0 %vm911_vm1, %v810_v25  ;;  %1424 = vmatprep.subr.mxu0 %v1727_v8 }
 0x6aa   : > { %1426 = vmatprep.mubr.msk.f32.mxu0 %vm1728_vm0, %v1727_v8 }
 0x6b2   : > { %v909_v31 = vpop.permute.xlu1 %908 }
 0x77a   : > { %v1052_v32 = vpop.f32.mrb[4].mxu1 }
 0x77b   : > { %v1053_v34 = vadd.f32 %v1052_v32, %v909_v31  ;;  %v1423_v35 = vpop.f32.mrb[5].mxu1 }
 0x77c   : > { %v981_v36 = vpop.f32.mrb[4].mxu0 }
 0x77d   : > { %v1058_v37 = vmax.f32 %v1053_v34, 0.0  ;;  %v982_v38 = vadd.f32 %v981_v36, %v909_v31  ;;  %v983_v39 = vpop.f32.mrb[5].mxu0 }
 0x77e   : > { %v984_v40 = vadd.f32 %v983_v39, %v909_v31 }
 0x77f   : > { %v1056_v41 = vmax.f32 %v982_v38, 0.0  ;;  %v1061_v44 = vmul.f32 %v1058_v37, %v1966_v27 }
 0x780   : > { %v1057_v43 = vmax.f32 %v984_v40, 0.0 }
 0x781   : > { %v1059_v45 = vmul.f32 %v1056_v41, %v1968_v30  ;;  %v1063_v8 = vsel %vm592_vm11, %v1061_v44, 0.0 }
 0x782   : > { %v1060_v46 = vmul.f32 %v1057_v43, %v1970_v33 }
 0x784   : > { %v1062_v47 = vadd.f32 %v1060_v46, %v1059_v45 }
 0x786   : > { %v1064_v48 = vadd.f32 %v1063_v8, %v1062_v47 }
 0x788   : > { %1065 = vadd.xlane.f32.xlu0 %v1064_v48 }
 0x79e   : > { %1230 = vrot.lane.b32.xlu0 %v2019_v26, %s1722_s11  ;;  %s1479_s11 = smul.u32 24, %s1873_s29 }
 0x7a0   : > { %s294_s18 = scalar_lea.vmem [#allocation6], %s1479_s11 }
 0x7a1   : > { %s1267_s14 = sshll.u32 %s294_s18, 4  ;;  %s2074_s14 = int_to_ptr.vmem [resolvable:$true] %s1267_s14 }
 0x7a2   : > { %1243 = vperm.xlu0 %1577, %v2019_v26   ;;  %s1650_s9 = scalar_lea.vmem %s2074_s14, 384  ;;  %p1657_p5 = scmp.lt.s32.totalorder %s2074_s14, %s1655_s17 }
 0x7a3   : > { %p1651_p6 = scmp.ne.s32.totalorder %s2074_s14, %s1650_s9  ;;  %p1658_p10 = scmp.lt.s32.totalorder %s1656_s20, %s1650_s9 }
 0x7a5   : > { %p1652_p12 = pnand %p1651_p6, %p2132_p11  ;;  %p1659_p2 = por %p1658_p10, %p1657_p5 }
 0x7a7   : > { %p1653_p13 = pneg %p1652_p12 }
 0x7a9   : > { %p1660_p4 = pnand %p1659_p2, %p1653_p13 }
 0x815   : > { %v1066_v49 = vpop.xlane.xlu0 %1065 }
 0x816   : > { %1425 = vmatpush3.msra.mxu0 %v1066_v49 }
 0x817   : > { %1427 = vmatmul.mubr.msk.f32.vlgmr.msra.gmra.mrb[6].mxu0 %vm597_vm12, %v1981_v42 }
 0x819   : > { %v1231_v5 = vpop.permute.xlu0 %1230 }
 0x8ea   : > { %v1133_v50 = vpop.f32.mrb[6].mxu0 }
 0x8eb   : > { %v1137_v51 = vmul.f32 0.0009765625, %v1133_v50  ;;  %v1428_v52 = vpop.f32.mrb[7].mxu0 }
 0x8ed   : > { %1140 = vperm.xlu1 %1576, %v1137_v51  }
 0x96c   : > { %v1141_v53 = vpop.permute.xlu1 %1140 }
 0x96d   : > { %v1143_v54 = vsub.f32 %v1059_v45, %v1141_v53  ;;  %v1144_v55 = vsub.f32 %v1060_v46, %v1141_v53  ;;  %v1145_v56 = vsub.f32 %v1061_v44, %v1141_v53 }
 0x96f   : > { %v1146_v57 = vmul.f32 %v1143_v54, %v1968_v30  ;;  %v1147_v58 = vmul.f32 %v1144_v55, %v1970_v33  ;;  %v1148_v59 = vmul.f32 %v1145_v56, %v1966_v27 }
 0x971   : > { %v1149_v26 = vmul.f32 %v1146_v57, %v1146_v57  ;;  %v1150_v60 = vmul.f32 %v1147_v58, %v1147_v58  ;;  %v1151_v61 = vmul.f32 %v1148_v59, %v1148_v59 }
 0x973   : > { %v1152_v62 = vadd.f32 %v1150_v60, %v1149_v26  ;;  %v1153_v63 = vsel %vm592_vm11, %v1151_v61, 0.0 }
 0x975   : > { %v1154_v0 = vadd.f32 %v1153_v63, %v1152_v62 }
 0x977   : > { %1155 = vadd.xlane.f32.xlu1 %v1154_v0 }
 0xa04   : > { %v1156_v1 = vpop.xlane.xlu1 %1155 }
 0xa05   : > { %1430 = vmatpush3.msra.mxu1 %v1156_v1 }
 0xa06   : > { %1432 = vmatmul.mubr.msk.f32.vlgmr.msra.gmra.mrb[6].mxu1 %vm597_vm12, %v1981_v42  ;;  %v1244_v42 = vpop.permute.xlu0 %1243 }
 0xad9   : > { %v1223_v30 = vpop.f32.mrb[6].mxu1 }
 0xada   : > { %v1227_v3 = vmul.f32 0.0009765625, %v1223_v30  ;;  %v1433_v33 = vpop.f32.mrb[7].mxu1 }
 0xadc   : > { %v1228_v4 = vadd.f32 1e-05, %v1227_v3 }
 0xade   : > { %1618 = vrsqrt.f32 %v1228_v4 }
 0xae8   : > { %v1619_v27 = vpop.eup %1618 }
 0xae9   : > { %v1233_v6 = vmul.f32 %v1619_v27, %v1231_v5 }
 0xaeb   : > { %1236 = vperm.xlu1 %1576, %v1233_v6  }
 0xb6a   : > { %v1237_v7 = vpop.permute.xlu1 %1236 }
 0xb6b   : > { %v1239_v9 = vmul.f32 %v1237_v7, %v1146_v57  ;;  %v1240_v11 = vmul.f32 %v1237_v7, %v1147_v58  ;;  %v1241_v12 = vmul.f32 %v1237_v7, %v1148_v59 }
 0xb6d   : > { %v1246_v13 = vadd.f32 %v1244_v42, %v1239_v9  ;;  %v1247_v14 = vadd.f32 %v1244_v42, %v1240_v11  ;;  %v1248_v10 = vadd.f32 %v1244_v42, %v1241_v12 }
 0xb6f   : > { %1249 = vst [vmem:[%s294_s18] sm:$0xff] %v1246_v13  ;;  %1250 = vst [vmem:[%s294_s18 + $0x8] sm:$0xff] %v1247_v14 }
 0xb70   : > { %1251 = vst.msk [vmem:[%s294_s18 + $0x10] sm:$0xff] %vm592_vm11, %v1248_v10 }
 0xb71   : > { %1663 = shalt.err (!%p1660_p4)
}
 0xb72   : > { %s1664_s29 = scalar_lea.hbm %s2072_s8, 384  ;;  %s1668_s11 = scalar_lea.hbm %s2124_s7, 768 }
 0xb73   : > { %p1665_p7 = scmp.ne.s32.totalorder %s2072_s8, %s1664_s29  ;;  %p1669_p0 = scmp.lt.u32.totalorder %s2072_s8, %s2124_s7 }
 0xb74   : > { %p1670_p1 = scmp.lt.u32.totalorder %s1668_s11, %s1664_s29  ;;  %p1672_p6 = scmp.lt.u32.totalorder %s1664_s29, %s2072_s8 }
 0xb75   : > { %p1666_p8 = pnand %p1665_p7, %p2132_p11 }
 0xb76   : > { %p1671_p3 = por %p1670_p1, %p1669_p0 }
 0xb77   : > { %p1667_p9 = pneg %p1666_p8 }
 0xb78   : > { %p1673_p12 = por %p1672_p6, %p1671_p3 }
 0xb7a   : > { %p1674_p13 = pnand %p1673_p12, %p1667_p9 }
 0xb7c   : > { %1677 = shalt.err (!%p1674_p13)
}
 0xb7d   : > { %1483 = dma.vmem_to_hbm [thread:$0]  (%p2132_p11), %s2074_s14, 384, %s2072_s8, %s1253_s28  }
 0xb7e PF: > { %s1279_s16 = sand.u32 1, %s1704_s24   ;;  %p2133_p5 = scmp.ne.s32.totalorder %s2128_s13, 0 }
 0xb7f   : > { %p2134_p10 = scmp.ge.s32.totalorder %s1716_s27, 2  ;;  %s1280_s21 = scalar_lea.sflag [#allocation5], %s1279_s16 }
 0xb81   : > { %p1490_p2 = pnand %p2134_p10, %p2133_p5 }
 0xb83   : > { %1699 = dma.done.wait (!%p1490_p2), %s1280_s21, 384  }
 0xb84   : > { %1701 = vsyncadd (!%p1490_p2), %s1280_s21, 4294966912  ;;  %p20_p4 = scmp.ge.s32.totalorder %s1799_s30, 4   ;;  %s2135_s24 = smov %s1708_s25 }
 0xb85   : > { %s2136_s25 = smov %s1712_s26  ;;  %s2137_s26 = smov %s1811_s10 }
 0xb86   : > { %s2138_s27 = smov %s1799_s30  ;;  %22 = sbr.rel (!%p20_p4) target bundleno = 5 (0x5), region = 93 }
 0xb8d   :  { %1285 = vsyncpa [#allocation4], 1 }
 0xb8e   :  { %1287 = vsyncpa [#allocation4 + $0x1], 1 }
 0xb8f   :  { %1288 = vsyncpa [#allocation5], 1 }
 0xb90   :  { %1290 = vsyncpa [#allocation5 + $0x1], 1 }

</bundles_post_ra>
